<compile_context>
chip_gen: v7x
topology: tpu7x:2x2x1
jax: 0.10.0
libtpu: 0.0.40
codegen_flags: <defaults>
</compile_context>

<pallas_src>
import functools

import jax
import jax.numpy as jnp
from jax.experimental import pallas as pl
from jax.experimental.pallas import tpu as pltpu


# ----------------------------- kernel -------------------------------------


def _linear_tanh_sigmoid_kernel(x_ref, w_ref, b_ref, o_ref):
    # x_ref: [Bp, Kp] bf16 (resident), w_ref: [Kp, tile_e] bf16 (streamed),
    # b_ref: [1, tile_e] f32, o_ref: [Bp, tile_e] f32
    y = jnp.dot(x_ref[...], w_ref[...], preferred_element_type=jnp.float32)
    y = y + b_ref[...]
    # TODO(synk): training-mode dropout (args.input_drop) would need
    # pltpu.prng_seed + pltpu.prng_random_bits here; eval mode -> identity.
    o_ref[...] = jax.nn.sigmoid(jnp.tanh(y)).astype(o_ref.dtype)


# ----------------------------- tiling / sizing -----------------------------


def _round_up(v, m):
    return (v + m - 1) // m * m


def _cdiv(a, b):
    return (a + b - 1) // b


def _vmem_bytes(Bp, Kp, tile_e):
    """Double-buffered working set of one grid step (bytes)."""
    w = Kp * tile_e * 2          # bf16 weight tile
    o = Bp * tile_e * 4          # f32 output tile
    b = 8 * tile_e * 4           # bias tile (sublane-padded)
    x = max(Bp, 8) * Kp * 2      # resident activation
    return 2 * (w + o + b) + 2 * x


def _choose_tiling(E, Kp, Bp_hint, *, target_tile_e=8192, vmem_budget=44 << 20):
    """Pick (tile_e, Ep): big lane-dense tiles, even tile count, VMEM-budgeted."""
    units = _cdiv(E, 128)                                   # 128-wide columns
    tgt_units = max(1, min(target_tile_e // 128, units))
    # Shrink the target tile until the double-buffered working set fits the
    # per-TensorCore budget (44 MiB keeps us under v7x's 64 MiB with headroom).
    while tgt_units > 1 and _vmem_bytes(Bp_hint, Kp, tgt_units * 128) > vmem_budget:
        tgt_units = (tgt_units + 1) // 2
    # At least 4 tiles when E allows it (2 per core on v7x for double-buffering)
    num_tiles = max(_cdiv(units, tgt_units), min(4, units))
    if num_tiles > 1 and num_tiles % 2 == 1:
        num_tiles += 1                                       # even -> v7x balance
    tile_units = _cdiv(units, num_tiles)
    tile_e = tile_units * 128
    return tile_e, tile_e * num_tiles


# ----------------------------- wrapper -------------------------------------


def linear_tanh_sigmoid_prepadded(x, w_p, b_p, *, tile_e):
    """x: [B, K] f32; w_p: [Kp, Ep] bf16 (pre-padded); b_p: [1, Ep] f32.

    Returns sigmoid(tanh(x @ w + b)) as f32 [Bp, Ep] (caller slices valid part).
    """
    B, K = x.shape
    Kp, Ep = w_p.shape
    assert K <= Kp and Ep % tile_e == 0
    Bp = _round_up(B, 8)

    # Only the tiny activation is padded/cast per call (Bp x Kp bf16).
    x_p = jnp.zeros((Bp, Kp), jnp.bfloat16).at[:B, :K].set(x.astype(jnp.bfloat16))

    vmem_need = _vmem_bytes(Bp, Kp, tile_e)
    vmem_limit = int(min(max(vmem_need + (vmem_need >> 2) + (2 << 20), 16 << 20),
                         60 << 20))   # <= v7x 64 MiB/TC; v5e/v6e have 128 MiB

    cost = pl.CostEstimate(
        flops=2 * Bp * Kp * Ep,
        transcendentals=2 * Bp * Ep,
        bytes_accessed=Kp * Ep * 2 + Bp * Ep * 4 + Bp * Kp * 2 + Ep * 4,
    )

    out_p = pl.pallas_call(
        _linear_tanh_sigmoid_kernel,
        out_shape=jax.ShapeDtypeStruct((Bp, Ep), jnp.float32),
        grid=(Ep // tile_e,),
        in_specs=[
            pl.BlockSpec((Bp, Kp), lambda e: (0, 0)),       # x: resident across E tiles
            pl.BlockSpec((Kp, tile_e), lambda e: (0, e)),   # weight: streamed once
            pl.BlockSpec((1, tile_e), lambda e: (0, e)),    # bias
        ],
        out_specs=pl.BlockSpec((Bp, tile_e), lambda e: (0, e)),
        compiler_params=pltpu.CompilerParams(
            dimension_semantics=("parallel",),              # megacore-shard E on v7x
            vmem_limit_bytes=vmem_limit,
        ),
        cost_estimate=cost,
    )(x_p, w_p, b_p)
    return out_p


@functools.partial(jax.jit, static_argnames=("tile_e", "num_entities"))
def my_model_forward(e1, rel, emb_e, emb_rel, w_p, b_p, *, tile_e, num_entities):
    """e1, rel: int32 [B, 1]; returns sigmoid(tanh(Linear(cat(emb_e[e1], emb_rel[rel]))))."""
    e1_emb = jnp.take(emb_e, e1[:, 0], axis=0)      # [B, D]  (squeeze(1))
    rel_emb = jnp.take(emb_rel, rel[:, 0], axis=0)  # [B, D]
    x = jnp.concatenate([e1_emb, rel_emb], axis=1)  # [B, 2D]
    out_p = linear_tanh_sigmoid_prepadded(x, w_p, b_p, tile_e=tile_e)
    B = e1.shape[0]
    # NOTE: padded entity columns / batch rows are nonzero (sigmoid(tanh(0))=0.5);
    # any downstream reduction must happen after this slice.
    return out_p[:B, :num_entities]


# ----------------------------- params --------------------------------------


def init_params(key, num_entities, num_relations, embedding_dim):
    k1, k2, k3, k4 = jax.random.split(key, 4)
    # xavier_normal_ for embeddings (as in MyModel.init())
    std_e = (2.0 / (num_entities + embedding_dim)) ** 0.5
    std_r = (2.0 / (num_relations + embedding_dim)) ** 0.5
    emb_e = std_e * jax.random.normal(k1, (num_entities, embedding_dim), jnp.float32)
    emb_rel = std_r * jax.random.normal(k2, (num_relations, embedding_dim), jnp.float32)
    # padding_idx=0 -> zero row
    emb_e = emb_e.at[0].set(0.0)
    emb_rel = emb_rel.at[0].set(0.0)
    # torch.nn.Linear default init: U(-1/sqrt(fan_in), 1/sqrt(fan_in)),
    # stored as [in_features, out_features] for the kernel.
    fan_in = 2 * embedding_dim
    bound = 1.0 / (fan_in ** 0.5)
    lin_w = jax.random.uniform(k3, (fan_in, num_entities), jnp.float32, -bound, bound)
    lin_b = jax.random.uniform(k4, (num_entities,), jnp.float32, -bound, bound)
    return {"emb_e": emb_e, "emb_rel": emb_rel, "lin_w": lin_w, "lin_b": lin_b}


def prepare_linear(lin_w, lin_b, *, batch_hint=8, target_tile_e=8192):
    """One-time prep: pad + cast the weight to bf16 [Kp, Ep], bias to f32 [1, Ep].

    Done once at init so the per-forward path never re-reads/re-writes the
    full f32 weight (it was ~3x the kernel's own HBM traffic).
    """
    K, E = lin_w.shape
    Kp = _round_up(K, 16)                       # bf16 sublane pack
    Bp_hint = _round_up(max(batch_hint, 1), 8)
    tile_e, Ep = _choose_tiling(E, Kp, Bp_hint, target_tile_e=target_tile_e)
    w_p = jnp.zeros((Kp, Ep), jnp.bfloat16).at[:K, :E].set(lin_w.astype(jnp.bfloat16))
    b_p = jnp.zeros((1, Ep), jnp.float32).at[0, :E].set(lin_b.astype(jnp.float32))
    return w_p, b_p, tile_e


# ----------------------------- demo / check --------------------------------


if __name__ == "__main__":
    num_entities = 384      # -> exercises E tiling (several 128-wide tiles)
    num_relations = 16
    embedding_dim = 48      # K = 2D = 96
    batch = 6               # not a multiple of 8 -> exercises batch padding

    key = jax.random.PRNGKey(0)
    params = init_params(key, num_entities, num_relations, embedding_dim)

    # Hoisted (one-time) weight pad + bf16 cast and tile selection.
    w_p, b_p, tile_e = prepare_linear(
        params["lin_w"], params["lin_b"], batch_hint=batch, target_tile_e=8192
    )
    w_p = jax.block_until_ready(w_p)
    b_p = jax.block_until_ready(b_p)

    ke, kr = jax.random.split(jax.random.PRNGKey(1))
    e1 = jax.random.randint(ke, (batch, 1), 0, num_entities, dtype=jnp.int32)
    rel = jax.random.randint(kr, (batch, 1), 0, num_relations, dtype=jnp.int32)

    pred = my_model_forward(
        e1, rel, params["emb_e"], params["emb_rel"], w_p, b_p,
        tile_e=tile_e, num_entities=num_entities,
    )
    pred = jax.block_until_ready(pred)

    # sanity check against pure-JAX f32 reference (kernel matmul is bf16 -> loose tol)
    x_ref = jnp.concatenate(
        [jnp.take(params["emb_e"], e1[:, 0], axis=0),
         jnp.take(params["emb_rel"], rel[:, 0], axis=0)], axis=1)
    ref = jax.nn.sigmoid(jnp.tanh(x_ref @ params["lin_w"] + params["lin_b"]))
    assert pred.shape == (batch, num_entities)
    assert jnp.max(jnp.abs(pred - ref)) < 2e-2, float(jnp.max(jnp.abs(pred - ref)))

    print("KERNEL_OK")
</pallas_src>

<mosaic_0001>
module attributes {stable_mosaic.version = 11 : i64} {
  func.func @_linear_tanh_sigmoid_kernel(%arg0: i32, %arg1: memref<8x96xbf16, #tpu.memory_space<vmem>>, %arg2: memref<96x128xbf16, #tpu.memory_space<vmem>>, %arg3: memref<1x128xf32, #tpu.memory_space<vmem>>, %arg4: memref<8x128xf32, #tpu.memory_space<vmem>>) attributes {dimension_semantics = [#tpu.dimension_semantics<parallel>], iteration_bounds = array<i64: 4>, scalar_prefetch = 0 : i64, scratch_operands = 0 : i64, tpu.core_type = #tpu.core_type<tc>, window_params = [{pipeline_mode = #tpu.pipeline_mode<synchronous>, transform_indices = @transform_0, window_bounds = array<i64: 8, 96>}, {transform_indices = @transform_1, window_bounds = array<i64: 96, 128>}, {transform_indices = @transform_2, window_bounds = array<i64: 1, 128>}, {transform_indices = @transform_3, window_bounds = array<i64: 8, 128>}]} {
    %c0 = arith.constant 0 : index
    %c0_0 = arith.constant 0 : index
    %0 = vector.load %arg1[%c0, %c0_0] : memref<8x96xbf16, #tpu.memory_space<vmem>>, vector<8x96xbf16>
    %c0_1 = arith.constant 0 : index
    %c0_2 = arith.constant 0 : index
    %1 = vector.load %arg2[%c0_1, %c0_2] : memref<96x128xbf16, #tpu.memory_space<vmem>>, vector<96x128xbf16>
    %cst = arith.constant dense<0.000000e+00> : vector<8x128xf32>
    %2 = tpu.matmul %0, %1, %cst {dimension_numbers = #tpu.dot_dimension_numbers<[1], [0], [0], [1], [0, 0, 1, 1], [], []>} : vector<8x96xbf16>, vector<96x128xbf16>, vector<8x128xf32> -> vector<8x128xf32>
    %c0_3 = arith.constant 0 : index
    %c0_4 = arith.constant 0 : index
    %3 = vector.load %arg3[%c0_3, %c0_4] : memref<1x128xf32, #tpu.memory_space<vmem>>, vector<1x128xf32>
    %4 = vector.broadcast %3 : vector<1x128xf32> to vector<8x128xf32>
    %5 = arith.addf %2, %4 : vector<8x128xf32>
    %6 = math.tanh %5 : vector<8x128xf32>
    %7 = arith.negf %6 : vector<8x128xf32>
    %8 = math.exp %7 : vector<8x128xf32>
    %cst_5 = arith.constant 1.000000e+00 : f32
    %9 = vector.broadcast %cst_5 : f32 to vector<8x128xf32>
    %10 = arith.addf %9, %8 : vector<8x128xf32>
    %11 = arith.divf %9, %10 : vector<8x128xf32>
    %c0_6 = arith.constant 0 : index
    %c0_7 = arith.constant 0 : index
    %12 = vector.load %arg4[%c0_6, %c0_7] : memref<8x128xf32, #tpu.memory_space<vmem>>, vector<8x128xf32>
    tpu.vector_store %arg4[%c0_6, %c0_7], %11 {strides = array<i32>} : memref<8x128xf32, #tpu.memory_space<vmem>>, vector<8x128xf32>,
    return
  }
  func.func @transform_0(%arg0: i32) -> (i32, i32) {
    %c0_i32 = arith.constant 0 : i32
    %c0_i32_0 = arith.constant 0 : i32
    %c0_i32_1 = arith.constant 0 : i32
    return %c0_i32, %c0_i32_0 : i32, i32
  }
  func.func @transform_1(%arg0: i32) -> (i32, i32) {
    %c0_i32 = arith.constant 0 : i32
    %c0_i32_0 = arith.constant 0 : i32
    return %c0_i32, %arg0 : i32, i32
  }
  func.func @transform_2(%arg0: i32) -> (i32, i32) {
    %c0_i32 = arith.constant 0 : i32
    %c0_i32_0 = arith.constant 0 : i32
    return %c0_i32, %arg0 : i32, i32
  }
  func.func @transform_3(%arg0: i32) -> (i32, i32) {
    %c0_i32 = arith.constant 0 : i32
    %c0_i32_0 = arith.constant 0 : i32
    return %c0_i32, %arg0 : i32, i32
  }
}

</mosaic_0001>

<bundles_post_ra>
// kernel: my_model_forward.1
= control target key start
LH: loop header
LB: loop body
LE: loop exit
PB: predicated region body
PF: predicated region fallthrough
CT: control target
= control target key end

     0   :  { %s572_s12 = smov 0   ;;  %s574_s13 = smov 0   ;;  %s632_s0 = inlined_call_operand.vmem [shape: bf16[8,96], index: 0, kind: input, shape index: {}]   ;;  %s633_s1 = inlined_call_operand.vmem [shape: bf16[96,512], index: 1, kind: input, shape index: {}]   ;;  %s634_s2 = inlined_call_operand.vmem [shape: f32[1,512], index: 2, kind: input, shape index: {}]   ;;  %s635_s3 = inlined_call_operand.vmem [shape: f32[8,512], index: 3, kind: output, shape index: {}]  }
   0x1   :  { %s576_s14 = smov 0  }
   0x2 LB: > { %s445_s15 = sadd.s32 4294967295, %s548_s14   ;;  %s589_s16 = sadd.s32 1, %s548_s14   ;;  %s548_s14 = sphi %s576_s14, %s638_s14   ;;  %s544_s13 = sphi %s574_s13, %s637_s13   ;;  %s540_s12 = sphi %s572_s12, %s636_s12  }
   0x3   : > { %s38_s17 = ssub.s32 %s548_s14, %s589_s16  ;;  %s41_s18 = sadd.s32 1, %s544_s13 }
   0x4   : > { %p39_p0 = scmp.eq.s32.totalorder %s38_s17, 0  ;;  %p48_p1 = scmp.ne.s32.totalorder %s544_s13, %s540_s12 }
   0x5   : > { %p49_p2 = scmp.eq.s32.totalorder %s548_s14, 0  ;;  %p448_p4 = scmp.ge.s32.totalorder %s548_s14, 4 }
   0x6   : > { %s598_s19 = scalar_select %p39_p0, %s544_s13, %s41_s18  }
   0x7   : > { %p50_p3 = por %p49_p2, %p48_p1  ;;  %129 = sbr.rel (%p448_p4) target bundleno = 26 (0x1a), region = 20 }
   0xe   : > { %132 = sbr.rel (!%p50_p3) target bundleno = 26 (0x1a), region = 24  ;;  %s134_s20 = sand.u32 (%p50_p3), 1, %s544_s13  }
   0xf   : > { %s449_s21 = sshll.u32 (%p50_p3), %s548_s14, 2  ;;  %s486_s22 = smul.u32 (%p50_p3), 48, %s134_s20 }
  0x10   : > { %s138_s25 = scalar_lea.vmem (%p50_p3), %s633_s1, %s449_s21 }
  0x11   : > { %v154_v0 = vld [vmem:[%s138_s25] sm:$0xf] (%p50_p3)  ;;  %v156_v1 = vld [vmem:[%s138_s25 + $0x10] sm:$0xf] (%p50_p3)  ;;  %s136_s26 = scalar_lea.vmem (%p50_p3), [#allocation2], %s486_s22 }
  0x12   : > { %v158_v2 = vld [vmem:[%s138_s25 + $0x20] sm:$0xf] (%p50_p3)  ;;  %v160_v3 = vld [vmem:[%s138_s25 + $0x30] sm:$0xf] (%p50_p3)  ;;  %155 = vst [vmem:[%s136_s26] sm:$0xf] (%p50_p3), %v154_v0 }
  0x13   : > { %v162_v4 = vld [vmem:[%s138_s25 + $0x40] sm:$0xf] (%p50_p3)  ;;  %157 = vst [vmem:[%s136_s26 + $0x4] sm:$0xf] (%p50_p3), %v156_v1  ;;  %159 = vst [vmem:[%s136_s26 + $0x8] sm:$0xf] (%p50_p3), %v158_v2 }
  0x14   : > { %161 = vst [vmem:[%s136_s26 + $0xc] sm:$0xf] (%p50_p3), %v160_v3  ;;  %163 = vst [vmem:[%s136_s26 + $0x10] sm:$0xf] (%p50_p3), %v162_v4  ;;  %v164_v5 = vld [vmem:[%s138_s25 + $0x50] sm:$0xf] (%p50_p3) }
  0x15   : > { %v166_v6 = vld [vmem:[%s138_s25 + $0x60] sm:$0xf]  ;;  %v168_v7 = vld [vmem:[%s138_s25 + $0x70] sm:$0xf]  ;;  %165 = vst [vmem:[%s136_s26 + $0x14] sm:$0xf] %v164_v5 }
  0x16   : > { %167 = vst [vmem:[%s136_s26 + $0x18] sm:$0xf] %v166_v6  ;;  %169 = vst [vmem:[%s136_s26 + $0x1c] sm:$0xf] %v168_v7  ;;  %v170_v8 = vld [vmem:[%s138_s25 + $0x80] sm:$0xf] }
  0x17   : > { %v172_v9 = vld [vmem:[%s138_s25 + $0x90] sm:$0xf]  ;;  %v174_v10 = vld [vmem:[%s138_s25 + $0xa0] sm:$0xf]  ;;  %171 = vst [vmem:[%s136_s26 + $0x20] sm:$0xf] %v170_v8 }
  0x18   : > { %173 = vst [vmem:[%s136_s26 + $0x24] sm:$0xf] %v172_v9  ;;  %175 = vst [vmem:[%s136_s26 + $0x28] sm:$0xf] %v174_v10  ;;  %v176_v11 = vld [vmem:[%s138_s25 + $0xb0] sm:$0xf] }
  0x19   : > { %177 = vst [vmem:[%s136_s26 + $0x2c] sm:$0xf] %v176_v11 }
  0x1a PF: > { %p450_p5 = scmp.ge.s32.totalorder %s548_s14, 1  ;;  %p229_p6 = scmp.lt.s32.totalorder %s548_s14, 5 }
  0x1c   : > { %p230_p7 = pnand %p450_p5, %p229_p6 }
  0x1d   : > { %s236_s27 = sand.u32 (!%p230_p7), 1, %s540_s12   ;;  %v550_v12 = vmov (!%p230_p7), 0.0   ;;  %vm551_vm0 = vmmov (!%p230_p7), 0   ;;  %v269_v19 = vld [vmem:[%s632_s0] sm:$0xf] (!%p230_p7)  ;;  %vm325_vm1 = vcmask (!%p230_p7), 785408  }
  0x1e   : > { %233 = sbr.rel (%p230_p7) target bundleno = 310 (0x136), region = 69  ;;  %470 = vmatprep.subr.bf16.mxu0 (!%p230_p7), %v550_v12  ;;  %482 = vmatprep.mubr.msk.bf16.mxu0 (!%p230_p7), %vm551_vm0, %v550_v12  ;;  %p261_p8 = scmp.lt.s32.totalorder (!%p230_p7), %s445_s15, 3 }
  0x1f   : > { %s487_s28 = smul.u32 (!%p230_p7), 48, %s236_s27 }
  0x21   : > { %s238_s29 = scalar_lea.vmem (!%p230_p7), [#allocation2], %s487_s28 }
  0x22   : > { %v514_v13 = vld [vmem:[%s238_s29] sm:$0xff] (!%p230_p7)   ;;  %v515_v14 = vld [vmem:[%s238_s29 + $0x8] sm:$0xff] (!%p230_p7)   ;;  %v516_v15 = vld [vmem:[%s238_s29 + $0x10] sm:$0xff] (!%p230_p7)  }
  0x23   : > { %471 = vmatpush3.bf16.msra.mxu0 (!%p230_p7), %v514_v13  ;;  %v517_v16 = vld [vmem:[%s238_s29 + $0x18] sm:$0xff] (!%p230_p7)   ;;  %v518_v17 = vld [vmem:[%s238_s29 + $0x20] sm:$0xff] (!%p230_p7)   ;;  %v519_v18 = vld [vmem:[%s238_s29 + $0x28] sm:$0xff] (!%p230_p7)  }
  0x24   : > { %472 = vmatprep.subr.bf16.mxu0 (!%p230_p7), %v550_v12 }
  0x25   : > { %s640_s15 = smov (!%p261_p8, %s445_s15), 3 }
  0x26   : > { %s263_s7 = scalar_lea.vmem %s634_s2, %s640_s15  ;;  %s451_s8 = sshll.u32 %s640_s15, 3 }
  0x27   : > { %473 = vmatpush3.bf16.msra.mxu0 %v515_v14  ;;  %v452_v20 = vld [vmem:[%s263_s7] ss:$0 sm:$0xff]  ;;  %s267_s11 = scalar_lea.vmem %s635_s3, %s451_s8 }
  0x28   : > { %474 = vmatprep.subr.bf16.mxu0 %v550_v12 }
  0x2b   : > { %475 = vmatpush3.bf16.msra.mxu0 %v516_v15 }
  0x2c   : > { %476 = vmatprep.subr.bf16.mxu0 %v550_v12 }
  0x2f   : > { %477 = vmatpush3.bf16.msra.mxu0 %v517_v16 }
  0x30   : > { %478 = vmatprep.subr.bf16.mxu0 %v550_v12 }
  0x33   : > { %479 = vmatpush3.bf16.msra.mxu0 %v518_v17 }
  0x34   : > { %480 = vmatprep.subr.bf16.mxu0 %v550_v12 }
  0x37   : > { %481 = vmatpush3.bf16.msra.mxu0 %v519_v18 }
  0x3a   : > { %483 = vmatmul.mubr.msk.bf16.vlgmr.msra.gmra.mrb[0].mxu0 %vm325_vm1, %v269_v19 }
 0x10d   : > { %v363_v21 = vpop.f32.mrb[0].mxu0 }
 0x10e   : > { %v364_v22 = vadd.f32 %v452_v20, %v363_v21  ;;  %v484_v23 = vpop.f32.mrb[1].mxu0 }
 0x10f   : > { %v366_v24 = vpop.f32.mrb[2].mxu0 }
 0x110   : > { %520 = vtanh.f32 %v364_v22  ;;  %v485_v25 = vpop.f32.mrb[3].mxu0 }
 0x11a   : > { %v521_v26 = vpop.eup %520 }
 0x11b   : > { %v460_v27 = vmul.f32 -1.442695, %v521_v26 }
 0x11d   : > { %522 = vpow2.f32 %v460_v27 }
 0x127   : > { %v523_v28 = vpop.eup %522 }
 0x128   : > { %v373_v29 = vadd.f32 1.0, %v523_v28 }
 0x12a   : > { %524 = vrcp.f32 %v373_v29 }
 0x134   : > { %v525_v30 = vpop.eup %524 }
 0x135   : > { %376 = vst [vmem:[%s267_s11] sm:$0xff] %v525_v30 }
 0x136 PF: > { %p10_p9 = scmp.ge.s32.totalorder %s589_s16, 6   ;;  %s636_s12 = smov %s544_s13 }
 0x137   : > { %s637_s13 = smov %s598_s19  ;;  %s638_s14 = smov %s589_s16 }
 0x138   :  { %12 = sbr.rel (!%p10_p9) target bundleno = 2 (0x2), region = 111 }

</bundles_post_ra>
